<compile_context>
chip_gen: v5e
topology: v5e:2x2
jax: 0.10.0
libtpu: 0.0.40
codegen_flags: <defaults>
</compile_context>

<pallas_src>
import jax
import jax.numpy as jnp
from jax import lax
from jax.experimental import pallas as pl
from jax.experimental.pallas import tpu as pltpu

LN_EPS = 1e-6


def embed_ln_kernel(ids_ref, table_hbm, pos_tok_ref, gamma_ref, beta_ref, o_ref,
                    gather_buf, row_sems):
    # ids_ref:     (B, S) int32 in SMEM (scalar prefetch)
    # table_hbm:   (V, E)        in HBM (memory_space=pl.ANY) — never enters VMEM whole
    # pos_tok_ref: (TILE_S, E)   f32 VMEM (position + token-type rows for this tile)
    # gamma/beta:  (1, E)        f32 VMEM (LayerNorm affine)
    # o_ref:       (1, TILE_S, E)
    # gather_buf:  (TILE_S, E)   VMEM scratch for the gathered embedding rows
    # row_sems:    (TILE_S,)     DMA semaphores, one per row copy
    b = pl.program_id(0)
    st = pl.program_id(1)
    tile_s = o_ref.shape[1]
    vocab = table_hbm.shape[0]
    base = st * tile_s

    # ---- Embedding row gather: HBM -> VMEM, one small DMA per token row. ----
    # All copies are issued first (so they are all in flight together), then
    # waited as a batch. ids come from SMEM scalar loads only.
    copies = []
    for i in range(tile_s):                       # static unroll; tile_s is small
        tok = ids_ref[b, base + i]
        tok = jnp.minimum(jnp.maximum(tok, 0), vocab - 1)   # clamp OOB ids
        cp = pltpu.make_async_copy(table_hbm.at[tok], gather_buf.at[i],
                                   row_sems.at[i])
        cp.start()
        copies.append(cp)
    for cp in copies:
        cp.wait()

    # ---- word + (pos + token_type), then fused LayerNorm over E. ----
    x = gather_buf[...].astype(jnp.float32) + pos_tok_ref[...]
    mean = jnp.mean(x, axis=-1, keepdims=True)
    xc = x - mean
    var = jnp.mean(xc * xc, axis=-1, keepdims=True)
    inv = lax.rsqrt(var + LN_EPS)                 # EUP slot
    y = (xc * inv) * gamma_ref[...] + beta_ref[...]
    o_ref[0] = y.astype(o_ref.dtype)


def create_word_embedding(ids, word_table, pos_emb, tok_type_emb, ln_gamma, ln_beta,
                          *, tile_s=None):
    """ids: (B, S) int; word_table: (V, E); pos_emb: (1, max_seq_len, E);
    tok_type_emb: (1, 1, E); ln_gamma/ln_beta: (E,). Returns (B, S, E)."""
    B, S = ids.shape
    V, E = word_table.shape

    if tile_s is None:
        tile_s = min(S, 256)                      # cap the per-step working set
    assert S % tile_s == 0, "sequence length must be divisible by tile_s"
    num_s_tiles = S // tile_s

    # Wrapper-side glue (runs once in XLA, not per grid step):
    #  * fold the (1,1,E) token-type row into the position rows,
    #  * present LN params as lane-dense (1, E),
    #  * ids as int32 for SMEM scalar prefetch.
    pos_tok = (pos_emb[0, :S, :] + tok_type_emb.reshape(1, E)).astype(jnp.float32)
    gamma = ln_gamma.reshape(1, E).astype(jnp.float32)
    beta = ln_beta.reshape(1, E).astype(jnp.float32)
    ids_i32 = ids.astype(jnp.int32)

    itemsize = jnp.dtype(word_table.dtype).itemsize
    cost = pl.CostEstimate(
        flops=8 * B * S * E,                       # adds + LayerNorm arithmetic
        transcendentals=B * S,                     # one rsqrt per row
        bytes_accessed=(4 * B * S                  # ids
                        + itemsize * B * S * E     # table rows actually touched
                        + 4 * S * E + 8 * E        # pos+tok, gamma, beta
                        + itemsize * B * S * E),   # output
    )

    grid_spec = pltpu.PrefetchScalarGridSpec(
        num_scalar_prefetch=1,                     # ids -> SMEM, visible to index_maps
        grid=(B, num_s_tiles),
        in_specs=[
            pl.BlockSpec(memory_space=pl.ANY),                       # vocab table (HBM)
            pl.BlockSpec((tile_s, E), lambda b, s, ids: (s, 0)),     # pos + token-type
            pl.BlockSpec((1, E), lambda b, s, ids: (0, 0)),          # LN gamma
            pl.BlockSpec((1, E), lambda b, s, ids: (0, 0)),          # LN beta
        ],
        out_specs=pl.BlockSpec((1, tile_s, E), lambda b, s, ids: (b, s, 0)),
        scratch_shapes=[
            pltpu.VMEM((tile_s, E), word_table.dtype),   # gathered embedding rows
            pltpu.SemaphoreType.DMA((tile_s,)),          # one sem per row DMA
        ],
    )

    return pl.pallas_call(
        embed_ln_kernel,
        out_shape=jax.ShapeDtypeStruct((B, S, E), word_table.dtype),
        grid_spec=grid_spec,
        compiler_params=pltpu.CompilerParams(
            dimension_semantics=("parallel", "parallel")),
        cost_estimate=cost,
    )(ids_i32, word_table, pos_tok, gamma, beta)


if __name__ == "__main__":
    # Small shapes consistent with the module; E lane-aligned (128), S sublane-aligned (8).
    B, S, V, E, MAX_S = 2, 8, 64, 128, 16

    key = jax.random.PRNGKey(0)
    k_ids, k_tab, k_pos, k_tok, k_g, k_b = jax.random.split(key, 6)

    ids = jax.random.randint(k_ids, (B, S), 0, V, dtype=jnp.int32)
    word_table = jax.random.normal(k_tab, (V, E), jnp.float32)          # nn.Embedding weight
    pos_emb = jax.random.normal(k_pos, (1, MAX_S, E), jnp.float32)      # randn buffer
    # Module inits token_type_embedding to zeros; use small non-zero values here to
    # actually exercise the add path (forward math is identical for any value).
    tok_type = 0.1 * jax.random.normal(k_tok, (1, 1, E), jnp.float32)
    ln_gamma = 1.0 + 0.05 * jax.random.normal(k_g, (E,), jnp.float32)
    ln_beta = 0.05 * jax.random.normal(k_b, (E,), jnp.float32)

    out = create_word_embedding(ids, word_table, pos_emb, tok_type, ln_gamma, ln_beta)
    out = jax.block_until_ready(out)

    # Pure-JAX reference (same math as the PyTorch forward).
    word = word_table[ids]                                  # (B, S, E) gather
    x = word + pos_emb[:, :S, :] + tok_type                 # broadcast adds
    mean = x.mean(-1, keepdims=True)
    var = ((x - mean) ** 2).mean(-1, keepdims=True)
    ref = (x - mean) / jnp.sqrt(var + LN_EPS) * ln_gamma + ln_beta

    assert out.shape == (B, S, E)
    assert jnp.allclose(out, ref, atol=1e-4, rtol=1e-4), "mismatch vs reference"
    print("KERNEL_OK")
</pallas_src>

<mosaic_0001>
module attributes {stable_mosaic.version = 11 : i64} {
  func.func @embed_ln_kernel(%arg0: i32, %arg1: i32, %arg2: memref<2x8xi32, #tpu.memory_space<smem>>, %arg3: memref<64x128xf32, #tpu.memory_space<any>>, %arg4: memref<8x128xf32, #tpu.memory_space<vmem>>, %arg5: memref<1x128xf32, #tpu.memory_space<vmem>>, %arg6: memref<1x128xf32, #tpu.memory_space<vmem>>, %arg7: memref<1x8x128xf32, #tpu.memory_space<vmem>>, %arg8: memref<8x128xf32, #tpu.memory_space<vmem>>, %arg9: memref<8x!tpu.dma_semaphore, #tpu.memory_space<semaphore_mem>>) attributes {dimension_semantics = [#tpu.dimension_semantics<parallel>, #tpu.dimension_semantics<parallel>], iteration_bounds = array<i64: 2, 1>, scalar_prefetch = 1 : i64, scratch_operands = 2 : i64, tpu.core_type = #tpu.core_type<tc>, window_params = [{}, {transform_indices = @transform_1, window_bounds = array<i64: 8, 128>}, {pipeline_mode = #tpu.pipeline_mode<synchronous>, transform_indices = @transform_2, window_bounds = array<i64: 1, 128>}, {pipeline_mode = #tpu.pipeline_mode<synchronous>, transform_indices = @transform_3, window_bounds = array<i64: 1, 128>}, {transform_indices = @transform_4, window_bounds = array<i64: 1, 8, 128>}]} {
    %c8_i32 = arith.constant 8 : i32
    %0 = arith.muli %arg1, %c8_i32 : i32
    %c0_i32 = arith.constant 0 : i32
    %1 = arith.addi %0, %c0_i32 : i32
    %2 = arith.index_cast %arg0 : i32 to index
    %3 = arith.index_cast %1 : i32 to index
    %4 = memref.load %arg2[%2, %3] : memref<2x8xi32, #tpu.memory_space<smem>>
    %c0_i32_0 = arith.constant 0 : i32
    %5 = arith.maxsi %4, %c0_i32_0 : i32
    %c63_i32 = arith.constant 63 : i32
    %6 = arith.minsi %5, %c63_i32 : i32
    %c0_i32_1 = arith.constant 0 : i32
    %c0_i32_2 = arith.constant 0 : i32
    %c0_i32_3 = arith.constant 0 : i32
    %7 = tpu.memref_slice %arg3[%6, %c0_i32_3] : memref<64x128xf32, #tpu.memory_space<any>> -> memref<1x128xf32, #tpu.memory_space<any>>
    %8 = tpu.memref_squeeze %7 : memref<1x128xf32, #tpu.memory_space<any>> -> memref<128xf32, #tpu.memory_space<any>>
    %c0_i32_4 = arith.constant 0 : i32
    %9 = tpu.memref_slice %arg8[%c0_i32_1, %c0_i32_4] : memref<8x128xf32, #tpu.memory_space<vmem>> -> memref<1x128xf32, #tpu.memory_space<vmem>>
    %10 = tpu.memref_squeeze %9 : memref<1x128xf32, #tpu.memory_space<vmem>> -> memref<128xf32, #tpu.memory_space<vmem>>
    %11 = tpu.memref_slice %arg9[%c0_i32_2] : memref<8x!tpu.dma_semaphore, #tpu.memory_space<semaphore_mem>> -> memref<1x!tpu.dma_semaphore, #tpu.memory_space<semaphore_mem>>
    %12 = tpu.memref_squeeze %11 : memref<1x!tpu.dma_semaphore, #tpu.memory_space<semaphore_mem>> -> memref<!tpu.dma_semaphore, #tpu.memory_space<semaphore_mem>>
    tpu.enqueue_dma source(%8 : memref<128xf32, #tpu.memory_space<any>>) target(%10 : memref<128xf32, #tpu.memory_space<vmem>>) target_semaphore(%12 : memref<!tpu.dma_semaphore, #tpu.memory_space<semaphore_mem>>)
    %c1_i32 = arith.constant 1 : i32
    %13 = arith.addi %0, %c1_i32 : i32
    %14 = arith.index_cast %arg0 : i32 to index
    %15 = arith.index_cast %13 : i32 to index
    %16 = memref.load %arg2[%14, %15] : memref<2x8xi32, #tpu.memory_space<smem>>
    %c0_i32_5 = arith.constant 0 : i32
    %17 = arith.maxsi %16, %c0_i32_5 : i32
    %c63_i32_6 = arith.constant 63 : i32
    %18 = arith.minsi %17, %c63_i32_6 : i32
    %c1_i32_7 = arith.constant 1 : i32
    %c1_i32_8 = arith.constant 1 : i32
    %c0_i32_9 = arith.constant 0 : i32
    %19 = tpu.memref_slice %arg3[%18, %c0_i32_9] : memref<64x128xf32, #tpu.memory_space<any>> -> memref<1x128xf32, #tpu.memory_space<any>>
    %20 = tpu.memref_squeeze %19 : memref<1x128xf32, #tpu.memory_space<any>> -> memref<128xf32, #tpu.memory_space<any>>
    %c0_i32_10 = arith.constant 0 : i32
    %21 = tpu.memref_slice %arg8[%c1_i32_7, %c0_i32_10] : memref<8x128xf32, #tpu.memory_space<vmem>> -> memref<1x128xf32, #tpu.memory_space<vmem>>
    %22 = tpu.memref_squeeze %21 : memref<1x128xf32, #tpu.memory_space<vmem>> -> memref<128xf32, #tpu.memory_space<vmem>>
    %23 = tpu.memref_slice %arg9[%c1_i32_8] : memref<8x!tpu.dma_semaphore, #tpu.memory_space<semaphore_mem>> -> memref<1x!tpu.dma_semaphore, #tpu.memory_space<semaphore_mem>>
    %24 = tpu.memref_squeeze %23 : memref<1x!tpu.dma_semaphore, #tpu.memory_space<semaphore_mem>> -> memref<!tpu.dma_semaphore, #tpu.memory_space<semaphore_mem>>
    tpu.enqueue_dma source(%20 : memref<128xf32, #tpu.memory_space<any>>) target(%22 : memref<128xf32, #tpu.memory_space<vmem>>) target_semaphore(%24 : memref<!tpu.dma_semaphore, #tpu.memory_space<semaphore_mem>>)
    %c2_i32 = arith.constant 2 : i32
    %25 = arith.addi %0, %c2_i32 : i32
    %26 = arith.index_cast %arg0 : i32 to index
    %27 = arith.index_cast %25 : i32 to index
    %28 = memref.load %arg2[%26, %27] : memref<2x8xi32, #tpu.memory_space<smem>>
    %c0_i32_11 = arith.constant 0 : i32
    %29 = arith.maxsi %28, %c0_i32_11 : i32
    %c63_i32_12 = arith.constant 63 : i32
    %30 = arith.minsi %29, %c63_i32_12 : i32
    %c2_i32_13 = arith.constant 2 : i32
    %c2_i32_14 = arith.constant 2 : i32
    %c0_i32_15 = arith.constant 0 : i32
    %31 = tpu.memref_slice %arg3[%30, %c0_i32_15] : memref<64x128xf32, #tpu.memory_space<any>> -> memref<1x128xf32, #tpu.memory_space<any>>
    %32 = tpu.memref_squeeze %31 : memref<1x128xf32, #tpu.memory_space<any>> -> memref<128xf32, #tpu.memory_space<any>>
    %c0_i32_16 = arith.constant 0 : i32
    %33 = tpu.memref_slice %arg8[%c2_i32_13, %c0_i32_16] : memref<8x128xf32, #tpu.memory_space<vmem>> -> memref<1x128xf32, #tpu.memory_space<vmem>>
    %34 = tpu.memref_squeeze %33 : memref<1x128xf32, #tpu.memory_space<vmem>> -> memref<128xf32, #tpu.memory_space<vmem>>
    %35 = tpu.memref_slice %arg9[%c2_i32_14] : memref<8x!tpu.dma_semaphore, #tpu.memory_space<semaphore_mem>> -> memref<1x!tpu.dma_semaphore, #tpu.memory_space<semaphore_mem>>
    %36 = tpu.memref_squeeze %35 : memref<1x!tpu.dma_semaphore, #tpu.memory_space<semaphore_mem>> -> memref<!tpu.dma_semaphore, #tpu.memory_space<semaphore_mem>>
    tpu.enqueue_dma source(%32 : memref<128xf32, #tpu.memory_space<any>>) target(%34 : memref<128xf32, #tpu.memory_space<vmem>>) target_semaphore(%36 : memref<!tpu.dma_semaphore, #tpu.memory_space<semaphore_mem>>)
    %c3_i32 = arith.constant 3 : i32
    %37 = arith.addi %0, %c3_i32 : i32
    %38 = arith.index_cast %arg0 : i32 to index
    %39 = arith.index_cast %37 : i32 to index
    %40 = memref.load %arg2[%38, %39] : memref<2x8xi32, #tpu.memory_space<smem>>
    %c0_i32_17 = arith.constant 0 : i32
    %41 = arith.maxsi %40, %c0_i32_17 : i32
    %c63_i32_18 = arith.constant 63 : i32
    %42 = arith.minsi %41, %c63_i32_18 : i32
    %c3_i32_19 = arith.constant 3 : i32
    %c3_i32_20 = arith.constant 3 : i32
    %c0_i32_21 = arith.constant 0 : i32
    %43 = tpu.memref_slice %arg3[%42, %c0_i32_21] : memref<64x128xf32, #tpu.memory_space<any>> -> memref<1x128xf32, #tpu.memory_space<any>>
    %44 = tpu.memref_squeeze %43 : memref<1x128xf32, #tpu.memory_space<any>> -> memref<128xf32, #tpu.memory_space<any>>
    %c0_i32_22 = arith.constant 0 : i32
    %45 = tpu.memref_slice %arg8[%c3_i32_19, %c0_i32_22] : memref<8x128xf32, #tpu.memory_space<vmem>> -> memref<1x128xf32, #tpu.memory_space<vmem>>
    %46 = tpu.memref_squeeze %45 : memref<1x128xf32, #tpu.memory_space<vmem>> -> memref<128xf32, #tpu.memory_space<vmem>>
    %47 = tpu.memref_slice %arg9[%c3_i32_20] : memref<8x!tpu.dma_semaphore, #tpu.memory_space<semaphore_mem>> -> memref<1x!tpu.dma_semaphore, #tpu.memory_space<semaphore_mem>>
    %48 = tpu.memref_squeeze %47 : memref<1x!tpu.dma_semaphore, #tpu.memory_space<semaphore_mem>> -> memref<!tpu.dma_semaphore, #tpu.memory_space<semaphore_mem>>
    tpu.enqueue_dma source(%44 : memref<128xf32, #tpu.memory_space<any>>) target(%46 : memref<128xf32, #tpu.memory_space<vmem>>) target_semaphore(%48 : memref<!tpu.dma_semaphore, #tpu.memory_space<semaphore_mem>>)
    %c4_i32 = arith.constant 4 : i32
    %49 = arith.addi %0, %c4_i32 : i32
    %50 = arith.index_cast %arg0 : i32 to index
    %51 = arith.index_cast %49 : i32 to index
    %52 = memref.load %arg2[%50, %51] : memref<2x8xi32, #tpu.memory_space<smem>>
    %c0_i32_23 = arith.constant 0 : i32
    %53 = arith.maxsi %52, %c0_i32_23 : i32
    %c63_i32_24 = arith.constant 63 : i32
    %54 = arith.minsi %53, %c63_i32_24 : i32
    %c4_i32_25 = arith.constant 4 : i32
    %c4_i32_26 = arith.constant 4 : i32
    %c0_i32_27 = arith.constant 0 : i32
    %55 = tpu.memref_slice %arg3[%54, %c0_i32_27] : memref<64x128xf32, #tpu.memory_space<any>> -> memref<1x128xf32, #tpu.memory_space<any>>
    %56 = tpu.memref_squeeze %55 : memref<1x128xf32, #tpu.memory_space<any>> -> memref<128xf32, #tpu.memory_space<any>>
    %c0_i32_28 = arith.constant 0 : i32
    %57 = tpu.memref_slice %arg8[%c4_i32_25, %c0_i32_28] : memref<8x128xf32, #tpu.memory_space<vmem>> -> memref<1x128xf32, #tpu.memory_space<vmem>>
    %58 = tpu.memref_squeeze %57 : memref<1x128xf32, #tpu.memory_space<vmem>> -> memref<128xf32, #tpu.memory_space<vmem>>
    %59 = tpu.memref_slice %arg9[%c4_i32_26] : memref<8x!tpu.dma_semaphore, #tpu.memory_space<semaphore_mem>> -> memref<1x!tpu.dma_semaphore, #tpu.memory_space<semaphore_mem>>
    %60 = tpu.memref_squeeze %59 : memref<1x!tpu.dma_semaphore, #tpu.memory_space<semaphore_mem>> -> memref<!tpu.dma_semaphore, #tpu.memory_space<semaphore_mem>>
    tpu.enqueue_dma source(%56 : memref<128xf32, #tpu.memory_space<any>>) target(%58 : memref<128xf32, #tpu.memory_space<vmem>>) target_semaphore(%60 : memref<!tpu.dma_semaphore, #tpu.memory_space<semaphore_mem>>)
    %c5_i32 = arith.constant 5 : i32
    %61 = arith.addi %0, %c5_i32 : i32
    %62 = arith.index_cast %arg0 : i32 to index
    %63 = arith.index_cast %61 : i32 to index
    %64 = memref.load %arg2[%62, %63] : memref<2x8xi32, #tpu.memory_space<smem>>
    %c0_i32_29 = arith.constant 0 : i32
    %65 = arith.maxsi %64, %c0_i32_29 : i32
    %c63_i32_30 = arith.constant 63 : i32
    %66 = arith.minsi %65, %c63_i32_30 : i32
    %c5_i32_31 = arith.constant 5 : i32
    %c5_i32_32 = arith.constant 5 : i32
    %c0_i32_33 = arith.constant 0 : i32
    %67 = tpu.memref_slice %arg3[%66, %c0_i32_33] : memref<64x128xf32, #tpu.memory_space<any>> -> memref<1x128xf32, #tpu.memory_space<any>>
    %68 = tpu.memref_squeeze %67 : memref<1x128xf32, #tpu.memory_space<any>> -> memref<128xf32, #tpu.memory_space<any>>
    %c0_i32_34 = arith.constant 0 : i32
    %69 = tpu.memref_slice %arg8[%c5_i32_31, %c0_i32_34] : memref<8x128xf32, #tpu.memory_space<vmem>> -> memref<1x128xf32, #tpu.memory_space<vmem>>
    %70 = tpu.memref_squeeze %69 : memref<1x128xf32, #tpu.memory_space<vmem>> -> memref<128xf32, #tpu.memory_space<vmem>>
    %71 = tpu.memref_slice %arg9[%c5_i32_32] : memref<8x!tpu.dma_semaphore, #tpu.memory_space<semaphore_mem>> -> memref<1x!tpu.dma_semaphore, #tpu.memory_space<semaphore_mem>>
    %72 = tpu.memref_squeeze %71 : memref<1x!tpu.dma_semaphore, #tpu.memory_space<semaphore_mem>> -> memref<!tpu.dma_semaphore, #tpu.memory_space<semaphore_mem>>
    tpu.enqueue_dma source(%68 : memref<128xf32, #tpu.memory_space<any>>) target(%70 : memref<128xf32, #tpu.memory_space<vmem>>) target_semaphore(%72 : memref<!tpu.dma_semaphore, #tpu.memory_space<semaphore_mem>>)
    %c6_i32 = arith.constant 6 : i32
    %73 = arith.addi %0, %c6_i32 : i32
    %74 = arith.index_cast %arg0 : i32 to index
    %75 = arith.index_cast %73 : i32 to index
    %76 = memref.load %arg2[%74, %75] : memref<2x8xi32, #tpu.memory_space<smem>>
    %c0_i32_35 = arith.constant 0 : i32
    %77 = arith.maxsi %76, %c0_i32_35 : i32
    %c63_i32_36 = arith.constant 63 : i32
    %78 = arith.minsi %77, %c63_i32_36 : i32
    %c6_i32_37 = arith.constant 6 : i32
    %c6_i32_38 = arith.constant 6 : i32
    %c0_i32_39 = arith.constant 0 : i32
    %79 = tpu.memref_slice %arg3[%78, %c0_i32_39] : memref<64x128xf32, #tpu.memory_space<any>> -> memref<1x128xf32, #tpu.memory_space<any>>
    %80 = tpu.memref_squeeze %79 : memref<1x128xf32, #tpu.memory_space<any>> -> memref<128xf32, #tpu.memory_space<any>>
    %c0_i32_40 = arith.constant 0 : i32
    %81 = tpu.memref_slice %arg8[%c6_i32_37, %c0_i32_40] : memref<8x128xf32, #tpu.memory_space<vmem>> -> memref<1x128xf32, #tpu.memory_space<vmem>>
    %82 = tpu.memref_squeeze %81 : memref<1x128xf32, #tpu.memory_space<vmem>> -> memref<128xf32, #tpu.memory_space<vmem>>
    %83 = tpu.memref_slice %arg9[%c6_i32_38] : memref<8x!tpu.dma_semaphore, #tpu.memory_space<semaphore_mem>> -> memref<1x!tpu.dma_semaphore, #tpu.memory_space<semaphore_mem>>
    %84 = tpu.memref_squeeze %83 : memref<1x!tpu.dma_semaphore, #tpu.memory_space<semaphore_mem>> -> memref<!tpu.dma_semaphore, #tpu.memory_space<semaphore_mem>>
    tpu.enqueue_dma source(%80 : memref<128xf32, #tpu.memory_space<any>>) target(%82 : memref<128xf32, #tpu.memory_space<vmem>>) target_semaphore(%84 : memref<!tpu.dma_semaphore, #tpu.memory_space<semaphore_mem>>)
    %c7_i32 = arith.constant 7 : i32
    %85 = arith.addi %0, %c7_i32 : i32
    %86 = arith.index_cast %arg0 : i32 to index
    %87 = arith.index_cast %85 : i32 to index
    %88 = memref.load %arg2[%86, %87] : memref<2x8xi32, #tpu.memory_space<smem>>
    %c0_i32_41 = arith.constant 0 : i32
    %89 = arith.maxsi %88, %c0_i32_41 : i32
    %c63_i32_42 = arith.constant 63 : i32
    %90 = arith.minsi %89, %c63_i32_42 : i32
    %c7_i32_43 = arith.constant 7 : i32
    %c7_i32_44 = arith.constant 7 : i32
    %c0_i32_45 = arith.constant 0 : i32
    %91 = tpu.memref_slice %arg3[%90, %c0_i32_45] : memref<64x128xf32, #tpu.memory_space<any>> -> memref<1x128xf32, #tpu.memory_space<any>>
    %92 = tpu.memref_squeeze %91 : memref<1x128xf32, #tpu.memory_space<any>> -> memref<128xf32, #tpu.memory_space<any>>
    %c0_i32_46 = arith.constant 0 : i32
    %93 = tpu.memref_slice %arg8[%c7_i32_43, %c0_i32_46] : memref<8x128xf32, #tpu.memory_space<vmem>> -> memref<1x128xf32, #tpu.memory_space<vmem>>
    %94 = tpu.memref_squeeze %93 : memref<1x128xf32, #tpu.memory_space<vmem>> -> memref<128xf32, #tpu.memory_space<vmem>>
    %95 = tpu.memref_slice %arg9[%c7_i32_44] : memref<8x!tpu.dma_semaphore, #tpu.memory_space<semaphore_mem>> -> memref<1x!tpu.dma_semaphore, #tpu.memory_space<semaphore_mem>>
    %96 = tpu.memref_squeeze %95 : memref<1x!tpu.dma_semaphore, #tpu.memory_space<semaphore_mem>> -> memref<!tpu.dma_semaphore, #tpu.memory_space<semaphore_mem>>
    tpu.enqueue_dma source(%92 : memref<128xf32, #tpu.memory_space<any>>) target(%94 : memref<128xf32, #tpu.memory_space<vmem>>) target_semaphore(%96 : memref<!tpu.dma_semaphore, #tpu.memory_space<semaphore_mem>>)
    %c0_i32_47 = arith.constant 0 : i32
    %c0_i32_48 = arith.constant 0 : i32
    %c0_i32_49 = arith.constant 0 : i32
    %97 = tpu.memref_slice %arg3[%6, %c0_i32_49] : memref<64x128xf32, #tpu.memory_space<any>> -> memref<1x128xf32, #tpu.memory_space<any>>
    %98 = tpu.memref_squeeze %97 : memref<1x128xf32, #tpu.memory_space<any>> -> memref<128xf32, #tpu.memory_space<any>>
    %c0_i32_50 = arith.constant 0 : i32
    %99 = tpu.memref_slice %arg8[%c0_i32_47, %c0_i32_50] : memref<8x128xf32, #tpu.memory_space<vmem>> -> memref<1x128xf32, #tpu.memory_space<vmem>>
    %100 = tpu.memref_squeeze %99 : memref<1x128xf32, #tpu.memory_space<vmem>> -> memref<128xf32, #tpu.memory_space<vmem>>
    %101 = tpu.memref_slice %arg9[%c0_i32_48] : memref<8x!tpu.dma_semaphore, #tpu.memory_space<semaphore_mem>> -> memref<1x!tpu.dma_semaphore, #tpu.memory_space<semaphore_mem>>
    %102 = tpu.memref_squeeze %101 : memref<1x!tpu.dma_semaphore, #tpu.memory_space<semaphore_mem>> -> memref<!tpu.dma_semaphore, #tpu.memory_space<semaphore_mem>>
    tpu.wait_dma2 semaphore(%102 : memref<!tpu.dma_semaphore, #tpu.memory_space<semaphore_mem>>) src(%98 : memref<128xf32, #tpu.memory_space<any>>) dst(%100 : memref<128xf32, #tpu.memory_space<vmem>>)
    %c1_i32_51 = arith.constant 1 : i32
    %c1_i32_52 = arith.constant 1 : i32
    %c0_i32_53 = arith.constant 0 : i32
    %103 = tpu.memref_slice %arg3[%18, %c0_i32_53] : memref<64x128xf32, #tpu.memory_space<any>> -> memref<1x128xf32, #tpu.memory_space<any>>
    %104 = tpu.memref_squeeze %103 : memref<1x128xf32, #tpu.memory_space<any>> -> memref<128xf32, #tpu.memory_space<any>>
    %c0_i32_54 = arith.constant 0 : i32
    %105 = tpu.memref_slice %arg8[%c1_i32_51, %c0_i32_54] : memref<8x128xf32, #tpu.memory_space<vmem>> -> memref<1x128xf32, #tpu.memory_space<vmem>>
    %106 = tpu.memref_squeeze %105 : memref<1x128xf32, #tpu.memory_space<vmem>> -> memref<128xf32, #tpu.memory_space<vmem>>
    %107 = tpu.memref_slice %arg9[%c1_i32_52] : memref<8x!tpu.dma_semaphore, #tpu.memory_space<semaphore_mem>> -> memref<1x!tpu.dma_semaphore, #tpu.memory_space<semaphore_mem>>
    %108 = tpu.memref_squeeze %107 : memref<1x!tpu.dma_semaphore, #tpu.memory_space<semaphore_mem>> -> memref<!tpu.dma_semaphore, #tpu.memory_space<semaphore_mem>>
    tpu.wait_dma2 semaphore(%108 : memref<!tpu.dma_semaphore, #tpu.memory_space<semaphore_mem>>) src(%104 : memref<128xf32, #tpu.memory_space<any>>) dst(%106 : memref<128xf32, #tpu.memory_space<vmem>>)
    %c2_i32_55 = arith.constant 2 : i32
    %c2_i32_56 = arith.constant 2 : i32
    %c0_i32_57 = arith.constant 0 : i32
    %109 = tpu.memref_slice %arg3[%30, %c0_i32_57] : memref<64x128xf32, #tpu.memory_space<any>> -> memref<1x128xf32, #tpu.memory_space<any>>
    %110 = tpu.memref_squeeze %109 : memref<1x128xf32, #tpu.memory_space<any>> -> memref<128xf32, #tpu.memory_space<any>>
    %c0_i32_58 = arith.constant 0 : i32
    %111 = tpu.memref_slice %arg8[%c2_i32_55, %c0_i32_58] : memref<8x128xf32, #tpu.memory_space<vmem>> -> memref<1x128xf32, #tpu.memory_space<vmem>>
    %112 = tpu.memref_squeeze %111 : memref<1x128xf32, #tpu.memory_space<vmem>> -> memref<128xf32, #tpu.memory_space<vmem>>
    %113 = tpu.memref_slice %arg9[%c2_i32_56] : memref<8x!tpu.dma_semaphore, #tpu.memory_space<semaphore_mem>> -> memref<1x!tpu.dma_semaphore, #tpu.memory_space<semaphore_mem>>
    %114 = tpu.memref_squeeze %113 : memref<1x!tpu.dma_semaphore, #tpu.memory_space<semaphore_mem>> -> memref<!tpu.dma_semaphore, #tpu.memory_space<semaphore_mem>>
    tpu.wait_dma2 semaphore(%114 : memref<!tpu.dma_semaphore, #tpu.memory_space<semaphore_mem>>) src(%110 : memref<128xf32, #tpu.memory_space<any>>) dst(%112 : memref<128xf32, #tpu.memory_space<vmem>>)
    %c3_i32_59 = arith.constant 3 : i32
    %c3_i32_60 = arith.constant 3 : i32
    %c0_i32_61 = arith.constant 0 : i32
    %115 = tpu.memref_slice %arg3[%42, %c0_i32_61] : memref<64x128xf32, #tpu.memory_space<any>> -> memref<1x128xf32, #tpu.memory_space<any>>
    %116 = tpu.memref_squeeze %115 : memref<1x128xf32, #tpu.memory_space<any>> -> memref<128xf32, #tpu.memory_space<any>>
    %c0_i32_62 = arith.constant 0 : i32
    %117 = tpu.memref_slice %arg8[%c3_i32_59, %c0_i32_62] : memref<8x128xf32, #tpu.memory_space<vmem>> -> memref<1x128xf32, #tpu.memory_space<vmem>>
    %118 = tpu.memref_squeeze %117 : memref<1x128xf32, #tpu.memory_space<vmem>> -> memref<128xf32, #tpu.memory_space<vmem>>
    %119 = tpu.memref_slice %arg9[%c3_i32_60] : memref<8x!tpu.dma_semaphore, #tpu.memory_space<semaphore_mem>> -> memref<1x!tpu.dma_semaphore, #tpu.memory_space<semaphore_mem>>
    %120 = tpu.memref_squeeze %119 : memref<1x!tpu.dma_semaphore, #tpu.memory_space<semaphore_mem>> -> memref<!tpu.dma_semaphore, #tpu.memory_space<semaphore_mem>>
    tpu.wait_dma2 semaphore(%120 : memref<!tpu.dma_semaphore, #tpu.memory_space<semaphore_mem>>) src(%116 : memref<128xf32, #tpu.memory_space<any>>) dst(%118 : memref<128xf32, #tpu.memory_space<vmem>>)
    %c4_i32_63 = arith.constant 4 : i32
    %c4_i32_64 = arith.constant 4 : i32
    %c0_i32_65 = arith.constant 0 : i32
    %121 = tpu.memref_slice %arg3[%54, %c0_i32_65] : memref<64x128xf32, #tpu.memory_space<any>> -> memref<1x128xf32, #tpu.memory_space<any>>
    %122 = tpu.memref_squeeze %121 : memref<1x128xf32, #tpu.memory_space<any>> -> memref<128xf32, #tpu.memory_space<any>>
    %c0_i32_66 = arith.constant 0 : i32
    %123 = tpu.memref_slice %arg8[%c4_i32_63, %c0_i32_66] : memref<8x128xf32, #tpu.memory_space<vmem>> -> memref<1x128xf32, #tpu.memory_space<vmem>>
    %124 = tpu.memref_squeeze %123 : memref<1x128xf32, #tpu.memory_space<vmem>> -> memref<128xf32, #tpu.memory_space<vmem>>
    %125 = tpu.memref_slice %arg9[%c4_i32_64] : memref<8x!tpu.dma_semaphore, #tpu.memory_space<semaphore_mem>> -> memref<1x!tpu.dma_semaphore, #tpu.memory_space<semaphore_mem>>
    %126 = tpu.memref_squeeze %125 : memref<1x!tpu.dma_semaphore, #tpu.memory_space<semaphore_mem>> -> memref<!tpu.dma_semaphore, #tpu.memory_space<semaphore_mem>>
    tpu.wait_dma2 semaphore(%126 : memref<!tpu.dma_semaphore, #tpu.memory_space<semaphore_mem>>) src(%122 : memref<128xf32, #tpu.memory_space<any>>) dst(%124 : memref<128xf32, #tpu.memory_space<vmem>>)
    %c5_i32_67 = arith.constant 5 : i32
    %c5_i32_68 = arith.constant 5 : i32
    %c0_i32_69 = arith.constant 0 : i32
    %127 = tpu.memref_slice %arg3[%66, %c0_i32_69] : memref<64x128xf32, #tpu.memory_space<any>> -> memref<1x128xf32, #tpu.memory_space<any>>
    %128 = tpu.memref_squeeze %127 : memref<1x128xf32, #tpu.memory_space<any>> -> memref<128xf32, #tpu.memory_space<any>>
    %c0_i32_70 = arith.constant 0 : i32
    %129 = tpu.memref_slice %arg8[%c5_i32_67, %c0_i32_70] : memref<8x128xf32, #tpu.memory_space<vmem>> -> memref<1x128xf32, #tpu.memory_space<vmem>>
    %130 = tpu.memref_squeeze %129 : memref<1x128xf32, #tpu.memory_space<vmem>> -> memref<128xf32, #tpu.memory_space<vmem>>
    %131 = tpu.memref_slice %arg9[%c5_i32_68] : memref<8x!tpu.dma_semaphore, #tpu.memory_space<semaphore_mem>> -> memref<1x!tpu.dma_semaphore, #tpu.memory_space<semaphore_mem>>
    %132 = tpu.memref_squeeze %131 : memref<1x!tpu.dma_semaphore, #tpu.memory_space<semaphore_mem>> -> memref<!tpu.dma_semaphore, #tpu.memory_space<semaphore_mem>>
    tpu.wait_dma2 semaphore(%132 : memref<!tpu.dma_semaphore, #tpu.memory_space<semaphore_mem>>) src(%128 : memref<128xf32, #tpu.memory_space<any>>) dst(%130 : memref<128xf32, #tpu.memory_space<vmem>>)
    %c6_i32_71 = arith.constant 6 : i32
    %c6_i32_72 = arith.constant 6 : i32
    %c0_i32_73 = arith.constant 0 : i32
    %133 = tpu.memref_slice %arg3[%78, %c0_i32_73] : memref<64x128xf32, #tpu.memory_space<any>> -> memref<1x128xf32, #tpu.memory_space<any>>
    %134 = tpu.memref_squeeze %133 : memref<1x128xf32, #tpu.memory_space<any>> -> memref<128xf32, #tpu.memory_space<any>>
    %c0_i32_74 = arith.constant 0 : i32
    %135 = tpu.memref_slice %arg8[%c6_i32_71, %c0_i32_74] : memref<8x128xf32, #tpu.memory_space<vmem>> -> memref<1x128xf32, #tpu.memory_space<vmem>>
    %136 = tpu.memref_squeeze %135 : memref<1x128xf32, #tpu.memory_space<vmem>> -> memref<128xf32, #tpu.memory_space<vmem>>
    %137 = tpu.memref_slice %arg9[%c6_i32_72] : memref<8x!tpu.dma_semaphore, #tpu.memory_space<semaphore_mem>> -> memref<1x!tpu.dma_semaphore, #tpu.memory_space<semaphore_mem>>
    %138 = tpu.memref_squeeze %137 : memref<1x!tpu.dma_semaphore, #tpu.memory_space<semaphore_mem>> -> memref<!tpu.dma_semaphore, #tpu.memory_space<semaphore_mem>>
    tpu.wait_dma2 semaphore(%138 : memref<!tpu.dma_semaphore, #tpu.memory_space<semaphore_mem>>) src(%134 : memref<128xf32, #tpu.memory_space<any>>) dst(%136 : memref<128xf32, #tpu.memory_space<vmem>>)
    %c7_i32_75 = arith.constant 7 : i32
    %c7_i32_76 = arith.constant 7 : i32
    %c0_i32_77 = arith.constant 0 : i32
    %139 = tpu.memref_slice %arg3[%90, %c0_i32_77] : memref<64x128xf32, #tpu.memory_space<any>> -> memref<1x128xf32, #tpu.memory_space<any>>
    %140 = tpu.memref_squeeze %139 : memref<1x128xf32, #tpu.memory_space<any>> -> memref<128xf32, #tpu.memory_space<any>>
    %c0_i32_78 = arith.constant 0 : i32
    %141 = tpu.memref_slice %arg8[%c7_i32_75, %c0_i32_78] : memref<8x128xf32, #tpu.memory_space<vmem>> -> memref<1x128xf32, #tpu.memory_space<vmem>>
    %142 = tpu.memref_squeeze %141 : memref<1x128xf32, #tpu.memory_space<vmem>> -> memref<128xf32, #tpu.memory_space<vmem>>
    %143 = tpu.memref_slice %arg9[%c7_i32_76] : memref<8x!tpu.dma_semaphore, #tpu.memory_space<semaphore_mem>> -> memref<1x!tpu.dma_semaphore, #tpu.memory_space<semaphore_mem>>
    %144 = tpu.memref_squeeze %143 : memref<1x!tpu.dma_semaphore, #tpu.memory_space<semaphore_mem>> -> memref<!tpu.dma_semaphore, #tpu.memory_space<semaphore_mem>>
    tpu.wait_dma2 semaphore(%144 : memref<!tpu.dma_semaphore, #tpu.memory_space<semaphore_mem>>) src(%140 : memref<128xf32, #tpu.memory_space<any>>) dst(%142 : memref<128xf32, #tpu.memory_space<vmem>>)
    %c0 = arith.constant 0 : index
    %c0_79 = arith.constant 0 : index
    %145 = vector.load %arg8[%c0, %c0_79] : memref<8x128xf32, #tpu.memory_space<vmem>>, vector<8x128xf32>
    %c0_80 = arith.constant 0 : index
    %c0_81 = arith.constant 0 : index
    %146 = vector.load %arg4[%c0_80, %c0_81] : memref<8x128xf32, #tpu.memory_space<vmem>>, vector<8x128xf32>
    %147 = arith.addf %145, %146 : vector<8x128xf32>
    %cst = arith.constant dense<0.000000e+00> : vector<8xf32>
    %148 = vector.multi_reduction <add>, %147, %cst [1] : vector<8x128xf32> to vector<8xf32>
    %149 = vector.shape_cast %148 : vector<8xf32> to vector<8x1xf32>
    %cst_82 = arith.constant 1.280000e+02 : f32
    %150 = vector.broadcast %cst_82 : f32 to vector<8x1xf32>
    %151 = arith.divf %149, %150 : vector<8x1xf32>
    %152 = vector.broadcast %151 : vector<8x1xf32> to vector<8x128xf32>
    %153 = arith.subf %147, %152 : vector<8x128xf32>
    %154 = arith.mulf %153, %153 : vector<8x128xf32>
    %cst_83 = arith.constant dense<0.000000e+00> : vector<8xf32>
    %155 = vector.multi_reduction <add>, %154, %cst_83 [1] : vector<8x128xf32> to vector<8xf32>
    %156 = vector.shape_cast %155 : vector<8xf32> to vector<8x1xf32>
    %cst_84 = arith.constant 1.280000e+02 : f32
    %157 = vector.broadcast %cst_84 : f32 to vector<8x1xf32>
    %158 = arith.divf %156, %157 : vector<8x1xf32>
    %cst_85 = arith.constant 9.99999997E-7 : f32
    %159 = vector.broadcast %cst_85 : f32 to vector<8x1xf32>
    %160 = arith.addf %158, %159 : vector<8x1xf32>
    %161 = math.rsqrt %160 : vector<8x1xf32>
    %162 = vector.broadcast %161 : vector<8x1xf32> to vector<8x128xf32>
    %163 = arith.mulf %153, %162 : vector<8x128xf32>
    %c0_86 = arith.constant 0 : index
    %c0_87 = arith.constant 0 : index
    %164 = vector.load %arg5[%c0_86, %c0_87] : memref<1x128xf32, #tpu.memory_space<vmem>>, vector<1x128xf32>
    %165 = vector.broadcast %164 : vector<1x128xf32> to vector<8x128xf32>
    %166 = arith.mulf %163, %165 : vector<8x128xf32>
    %c0_88 = arith.constant 0 : index
    %c0_89 = arith.constant 0 : index
    %167 = vector.load %arg6[%c0_88, %c0_89] : memref<1x128xf32, #tpu.memory_space<vmem>>, vector<1x128xf32>
    %168 = vector.broadcast %167 : vector<1x128xf32> to vector<8x128xf32>
    %169 = arith.addf %166, %168 : vector<8x128xf32>
    %c0_90 = arith.constant 0 : index
    %c0_91 = arith.constant 0 : index
    %c0_92 = arith.constant 0 : index
    %170 = vector.load %arg7[%c0_90, %c0_91, %c0_92] : memref<1x8x128xf32, #tpu.memory_space<vmem>>, vector<1x8x128xf32>
    %171 = vector.shape_cast %170 : vector<1x8x128xf32> to vector<8x128xf32>
    %172 = vector.shape_cast %169 : vector<8x128xf32> to vector<1x8x128xf32>
    tpu.vector_store %arg7[%c0_90, %c0_91, %c0_92], %172 {strides = array<i32>} : memref<1x8x128xf32, #tpu.memory_space<vmem>>, vector<1x8x128xf32>,
    return
  }
  func.func @transform_1(%arg0: i32, %arg1: i32, %arg2: memref<2x8xi32, #tpu.memory_space<smem>>) -> (i32, i32) {
    %c0_i32 = arith.constant 0 : i32
    %c0_i32_0 = arith.constant 0 : i32
    return %arg1, %c0_i32 : i32, i32
  }
  func.func @transform_2(%arg0: i32, %arg1: i32, %arg2: memref<2x8xi32, #tpu.memory_space<smem>>) -> (i32, i32) {
    %c0_i32 = arith.constant 0 : i32
    %c0_i32_0 = arith.constant 0 : i32
    %c0_i32_1 = arith.constant 0 : i32
    return %c0_i32, %c0_i32_0 : i32, i32
  }
  func.func @transform_3(%arg0: i32, %arg1: i32, %arg2: memref<2x8xi32, #tpu.memory_space<smem>>) -> (i32, i32) {
    %c0_i32 = arith.constant 0 : i32
    %c0_i32_0 = arith.constant 0 : i32
    %c0_i32_1 = arith.constant 0 : i32
    return %c0_i32, %c0_i32_0 : i32, i32
  }
  func.func @transform_4(%arg0: i32, %arg1: i32, %arg2: memref<2x8xi32, #tpu.memory_space<smem>>) -> (i32, i32, i32) {
    %c0_i32 = arith.constant 0 : i32
    %c0_i32_0 = arith.constant 0 : i32
    return %arg0, %arg1, %c0_i32 : i32, i32, i32
  }
}

</mosaic_0001>

<bundles_post_ra>
// kernel: tpu_custom_call.1
= control target key start
LH: loop header
LB: loop body
LE: loop exit
PB: predicated region body
PF: predicated region fallthrough
CT: control target
= control target key end

     0   :  { %s1133_s21 = smov [#allocation5]   ;;  %s1416_s0 = inlined_call_operand.hbm [shape: s32[2,8], index: 0, kind: input, shape index: {}]   ;;  %s1417_s1 = inlined_call_operand.hbm [shape: f32[64,128], index: 1, kind: input, shape index: {}]   ;;  %s1418_s2 = inlined_call_operand.hbm [shape: f32[8,128], index: 2, kind: input, shape index: {}]   ;;  %s1419_s3 = inlined_call_operand.vmem [shape: f32[1,128], index: 3, kind: input, shape index: {}]   ;;  %s1420_s4 = inlined_call_operand.vmem [shape: f32[1,128], index: 4, kind: input, shape index: {}]   ;;  %s1421_s5 = inlined_call_operand.hbm [shape: f32[2,8,128], index: 5, kind: output, shape index: {}]  }
   0x1   :  { %1426 = sst [smem:[#allocation42_spill]] %s1418_s2  ;;  %s11_s20 = sshll.u32 %s1416_s0, 4  ;;  %s12_s20 = int_to_ptr.hbm [resolvable:$true] %s11_s20 }
   0x2   :  { %14 = dma.hbm_to_smem %s12_s20, 32, %s1133_s21, [#allocation4] }
   0x3   :  { %1083 = dma.done.wait [#allocation4], 32 }
   0x4   :  { %1084 = vsyncadd [#allocation4], 4294967264 }
   0x5   :  { %17 = sfence }
   0x6   :  { %18 = vsyncpa [#allocation7], 0 }
   0x7   :  { %19 = vsyncpa [#allocation8], 0 }
   0x8   :  { %21 = vsyncpa [#allocation8 + $0x1], 0  ;;  %s1177_s22 = smov 0   ;;  %s1179_s23 = smov 0  }
   0x9   :  { %s1181_s24 = smov 0   ;;  %s1183_s25 = smov 0  }
   0xa   :  { %s1185_s26 = smov 0   ;;  %s1187_s0 = smov 0  }
   0xb LB: > { %1427 = sst [smem:[#allocation39_spill]] %s1127_s26  ;;  %s632_s27 = sadd.s32 4294967295, %s1131_s0   ;;  %s1131_s0 = sphi %s1187_s0, %s27_s0   ;;  %s1127_s26 = sphi %s1185_s26, %s1437_s26   ;;  %s1123_s25 = sphi %s1183_s25, %s1436_s25   ;;  %s1119_s24 = sphi %s1181_s24, %s1440_s24   ;;  %s1115_s23 = sphi %s1179_s23, %s1439_s23   ;;  %s1111_s22 = sphi %s1177_s22, %s1438_s22  }
   0xc   : > { %s633_s28 = sadd.s32 4294967294, %s1131_s0   ;;  %s39_s29 = sadd.s32 1, %s1127_s26 }
   0xd   : > { %s116_s30 = sadd.s32 1, %s1119_s24  ;;  %p41_p0 = scmp.ge.s32.totalorder %s39_s29, 2 }
   0xe   : > { %p126_p1 = scmp.ne.s32.totalorder %s1119_s24, %s1115_s23  ;;  %p127_p2 = scmp.eq.s32.totalorder %s632_s27, 1 }
   0xf   : > { %p132_p3 = scmp.ne.s32.totalorder %s1115_s23, %s1111_s22  ;;  %s1442_s29 = smov (%p41_p0, %s39_s29), 0 }
  0x10   : > { %1428 = sst [smem:[#allocation40_spill]] %s1442_s29  ;;  %p1217_p4 = por %p127_p2, %p126_p1 }
  0x11   : > { %p133_p5 = scmp.eq.s32.totalorder %s633_s28, 1  ;;  %s111_s7 = ssub.s32 %s1127_s26, %s1442_s29 }
  0x12   : > { %p634_p6 = scmp.ge.s32.totalorder %s1131_s0, 1  ;;  %p114_p7 = scmp.eq.s32.totalorder %s111_s7, 0 }
  0x13   : > { %p1224_p8 = por %p133_p5, %p132_p3  ;;  %p140_p9 = scmp.lt.s32.totalorder %s1131_s0, 3 }
  0x14   : > { %s1230_s9 = scalar_select %p114_p7, %s1119_s24, %s116_s30  }
  0x15   : > { %p141_p10 = pnand %p634_p6, %p140_p9  ;;  %p729_p11 = scmp.eq.s32.totalorder %s632_s27, 0 }
  0x16   : > { %s1431_s2 = sld [smem:[#allocation42_spill]]  ;;  %s1134_s13 = smov [#allocation6]  }
  0x17   : > { %p721_p12 = pneg %p141_p10  ;;  %s156_s14 = sshll.u32 %s1134_s13, 4  ;;  %s157_s14 = int_to_ptr.vmem [resolvable:$true] %s156_s14 }
  0x19   : > { %p722_p13 = pnand %p729_p11, %p721_p12  ;;  %175 = sbr.rel (%p141_p10) target bundleno = 452 (0x1c4), region = 32 }
  0x1c   : > { %s154_s12 = sshll.u32 %s1431_s2, 4  ;;  %s155_s12 = int_to_ptr.hbm [resolvable:$true] %s154_s12 }
  0x1d   : > { %724 = dma.hbm_to_vmem [thread:$0]  (!%p722_p13), %s155_s12, 128, %s157_s14, [#allocation7]  }
  0x1e   : > { %1086 = dma.done.wait (%p729_p11), [#allocation7], 128  }
  0x1f   : > { %1088 = vsyncadd (%p729_p11), [#allocation7], 4294967168  ;;  %s1422_s15 = sand.u32 1, %s1115_s23   ;;  %s1237_s16 = sshll.u32 %s1123_s25, 7 }
  0x20   : > { %s1241_s17 = sshll.u32 %s1422_s15, 3  ;;  %s203_s18 = sld [smem:[#allocation5 + %s1237_s16]] }
  0x21   : > { %s229_s19 = sadd.s32 1, %s1237_s16  ;;  %s1135_s20 = smov [#allocation2]  }
  0x22   : > { %s1245_s21 = sshll.u32 %s1135_s20, 4  ;;  %s1247_s27 = sld [smem:[#allocation5 + %s229_s19]]  ;;  %s219_s21 = int_to_ptr.vmem [resolvable:$true] %s1245_s21 }
  0x23   : > { %s258_s28 = sadd.s32 2, %s1237_s16  ;;  %s1136_s30 = smov [#allocation2 + $0x1]  }
  0x24   : > { %s1250_s7 = sshll.u32 %s1136_s30, 4  ;;  %s1252_s10 = sld [smem:[#allocation5 + %s258_s28]] }
  0x25   : > { %1432 = sst [smem:[#allocation41_spill]] %s1250_s7  ;;  %s1267_s7 = scalar_lea.hbm %s1417_s1, 64 }
  0x26   : > { %p204_p0 = scmp.gt.s32.totalorder %s203_s18, 0  ;;  %p640_p1 = scmp.lt.s32.totalorder %s203_s18, 63 }
  0x28   : > { %s1444_s18 = smov (!%p204_p0, %s203_s18), 0  ;;  %p231_p2 = scmp.gt.s32.totalorder %s1247_s27, 0 }
  0x29   : > { %s1446_s18 = smov (!%p640_p1, %s1444_s18), 63  ;;  %p646_p3 = scmp.lt.s32.totalorder %s1247_s27, 63 }
  0x2a   : > { %s232_s11 = scalar_select %p231_p2, %s1247_s27, 0 }
  0x2b   : > { %s208_s14 = scalar_lea.hbm %s1417_s1, %s1446_s18  ;;  %p260_p5 = scmp.gt.s32.totalorder %s1252_s10, 0 }
  0x2c   : > { %s216_s19 = sshll.u32 %s208_s14, 4  ;;  %p652_p6 = scmp.lt.s32.totalorder %s1252_s10, 63  ;;  %s217_s19 = int_to_ptr.hbm [resolvable:$true] %s216_s19 }
  0x2d   : > { %s839_s20 = sshra.s32 %s217_s19, 4  ;;  %s840_s20 = int_to_ptr.hbm [resolvable:$true] %s839_s20 }
  0x2e   : > { %s841_s28 = scalar_lea.hbm %s840_s20, 1  ;;  %p844_p9 = scmp.lt.s32.totalorder %s840_s20, %s1417_s1 }
  0x2f   : > { %p842_p7 = scmp.ne.s32.totalorder %s840_s20, %s841_s28  ;;  %p845_p10 = scmp.lt.s32.totalorder %s1267_s7, %s841_s28 }
  0x31   : > { %p846_p11 = por %p845_p10, %p844_p9 }
  0x33   : > { %p847_p12 = pnand %p846_p11, %p842_p7 }
  0x35   : > { %850 = shalt.err (!%p847_p12)  }
  0x36   : > { %221 = dma.hbm_to_vmem [thread:$0]  %s217_s19, 16, %s219_s21, [#allocation3] }
  0x37   : > { %s1448_s11 = smov (!%p646_p3, %s232_s11), 63  ;;  %s1137_s29 = smov [#allocation2 + $0x2]  }
  0x38   : > { %s261_s15 = scalar_select %p260_p5, %s1252_s10, 0 }
  0x39   : > { %s235_s2 = scalar_lea.hbm %s1417_s1, %s1448_s11  ;;  %s1281_s13 = sshll.u32 %s1137_s29, 4  ;;  %s277_s13 = int_to_ptr.vmem [resolvable:$true] %s1281_s13 }
  0x3a   : > { %s245_s14 = sshll.u32 %s235_s2, 4  ;;  %s287_s20 = sadd.s32 3, %s1237_s16  ;;  %s246_s14 = int_to_ptr.hbm [resolvable:$true] %s245_s14 }
  0x3b   : > { %s1284_s21 = sld [smem:[#allocation5 + %s287_s20]]  ;;  %s863_s27 = sshra.s32 %s246_s14, 4  ;;  %s864_s27 = int_to_ptr.hbm [resolvable:$true] %s863_s27 }
  0x3c   : > { %s865_s19 = scalar_lea.hbm %s864_s27, 1  ;;  %p868_p0 = scmp.lt.s32.totalorder %s864_s27, %s1417_s1 }
  0x3d   : > { %p866_p13 = scmp.ne.s32.totalorder %s864_s27, %s865_s19  ;;  %p869_p1 = scmp.lt.s32.totalorder %s1267_s7, %s865_s19 }
  0x3f   : > { %p870_p2 = por %p869_p1, %p868_p0 }
  0x41   : > { %p871_p3 = pnand %p870_p2, %p866_p13 }
  0x43   : > { %874 = shalt.err (!%p871_p3)  }
  0x44   : > { %s1433_s11 = sld [smem:[#allocation41_spill]]  ;;  %s1450_s15 = smov (!%p652_p6, %s261_s15), 63 }
  0x45   : > { %s264_s29 = scalar_lea.hbm %s1417_s1, %s1450_s15  ;;  %s316_s20 = sadd.s32 4, %s1237_s16 }
  0x46   : > { %s274_s27 = sshll.u32 %s264_s29, 4  ;;  %s1138_s19 = smov [#allocation2 + $0x3]   ;;  %s275_s27 = int_to_ptr.hbm [resolvable:$true] %s274_s27 }
  0x47   : > { %s1299_s28 = sshll.u32 %s1138_s19, 4  ;;  %p289_p5 = scmp.gt.s32.totalorder %s1284_s21, 0  ;;  %s306_s28 = int_to_ptr.vmem [resolvable:$true] %s1299_s28 }
  0x48   : > { %s887_s30 = sshra.s32 %s275_s27, 4  ;;  %s888_s30 = int_to_ptr.hbm [resolvable:$true] %s887_s30 }
  0x49   : > { %p892_p6 = scmp.lt.s32.totalorder %s888_s30, %s1417_s1 }
  0x4a   : > { %s1434_s18 = int_to_ptr.vmem [resolvable:$true] %s1433_s11  ;;  %s889_s11 = scalar_lea.hbm %s888_s30, 1 }
  0x4b   : > { %250 = dma.hbm_to_vmem [thread:$0]  %s246_s14, 16, %s1434_s18, [#allocation3 + $0x1] }
  0x4c   : > { %p890_p7 = scmp.ne.s32.totalorder %s888_s30, %s889_s11  ;;  %p893_p9 = scmp.lt.s32.totalorder %s1267_s7, %s889_s11 }
  0x4e   : > { %p894_p10 = por %p893_p9, %p892_p6 }
  0x50   : > { %p895_p11 = pnand %p894_p10, %p890_p7 }
  0x52   : > { %898 = shalt.err (!%p895_p11)  }
  0x53   : > { %279 = dma.hbm_to_vmem [thread:$0]  %s275_s27, 16, %s277_s13, [#allocation3 + $0x2] }
  0x54   : > { %s290_s10 = scalar_select %p289_p5, %s1284_s21, 0 }
  0x55   : > { %p658_p12 = scmp.lt.s32.totalorder %s1284_s21, 63  ;;  %s317_s15 = sld [smem:[#allocation5 + %s316_s20]] }
  0x56   : > { %s345_s18 = sadd.s32 5, %s1237_s16  ;;  %s1139_s12 = smov [#allocation2 + $0x4]  }
  0x57   : > { %s1452_s10 = smov (!%p658_p12, %s290_s10), 63  ;;  %s1309_s2 = sshll.u32 %s1139_s12, 4  ;;  %s335_s2 = int_to_ptr.vmem [resolvable:$true] %s1309_s2 }
  0x58   : > { %s1311_s26 = sld [smem:[#allocation5 + %s345_s18]]  ;;  %s293_s13 = scalar_lea.hbm %s1417_s1, %s1452_s10 }
  0x59   : > { %s303_s27 = sshll.u32 %s293_s13, 4  ;;  %s304_s27 = int_to_ptr.hbm [resolvable:$true] %s303_s27 }
  0x5a   : > { %s911_s21 = sshra.s32 %s304_s27, 4  ;;  %s912_s21 = int_to_ptr.hbm [resolvable:$true] %s911_s21 }
  0x5b   : > { %p318_p13 = scmp.gt.s32.totalorder %s317_s15, 0  ;;  %s913_s20 = scalar_lea.hbm %s912_s21, 1 }
  0x5c   : > { %p914_p0 = scmp.ne.s32.totalorder %s912_s21, %s913_s20  ;;  %p916_p1 = scmp.lt.s32.totalorder %s912_s21, %s1417_s1 }
  0x5d   : > { %p917_p2 = scmp.lt.s32.totalorder %s1267_s7, %s913_s20 }
  0x5f   : > { %p918_p3 = por %p917_p2, %p916_p1 }
  0x61   : > { %p919_p5 = pnand %p918_p3, %p914_p0 }
  0x63   : > { %922 = shalt.err (!%p919_p5)  }
  0x64   : > { %308 = dma.hbm_to_vmem [thread:$0]  %s304_s27, 16, %s306_s28, [#allocation3 + $0x3] }
  0x65   : > { %s319_s14 = scalar_select %p318_p13, %s317_s15, 0 }
  0x66   : > { %p664_p7 = scmp.lt.s32.totalorder %s317_s15, 63  ;;  %p347_p6 = scmp.gt.s32.totalorder %s1311_s26, 0 }
  0x67   : > { %p670_p9 = scmp.lt.s32.totalorder %s1311_s26, 63  ;;  %s1140_s19 = smov [#allocation2 + $0x5]  }
  0x68   : > { %s1454_s14 = smov (!%p664_p7, %s319_s14), 63  ;;  %s1328_s13 = sshll.u32 %s1140_s19, 4  ;;  %s364_s13 = int_to_ptr.vmem [resolvable:$true] %s1328_s13 }
  0x69   : > { %s348_s10 = scalar_select %p347_p6, %s1311_s26, 0 }
  0x6a   : > { %s322_s29 = scalar_lea.hbm %s1417_s1, %s1454_s14  ;;  %s374_s28 = sadd.s32 6, %s1237_s16 }
  0x6b   : > { %s332_s21 = sshll.u32 %s322_s29, 4  ;;  %s1331_s27 = sld [smem:[#allocation5 + %s374_s28]]  ;;  %s333_s21 = int_to_ptr.hbm [resolvable:$true] %s332_s21 }
  0x6c   : > { %s935_s20 = sshra.s32 %s333_s21, 4  ;;  %s936_s20 = int_to_ptr.hbm [resolvable:$true] %s935_s20 }
  0x6d   : > { %s937_s15 = scalar_lea.hbm %s936_s20, 1  ;;  %p940_p11 = scmp.lt.s32.totalorder %s936_s20, %s1417_s1 }
  0x6e   : > { %p938_p10 = scmp.ne.s32.totalorder %s936_s20, %s937_s15  ;;  %p941_p12 = scmp.lt.s32.totalorder %s1267_s7, %s937_s15 }
  0x70   : > { %p942_p13 = por %p941_p12, %p940_p11 }
  0x72   : > { %p943_p0 = pnand %p942_p13, %p938_p10 }
  0x74   : > { %946 = shalt.err (!%p943_p0)  }
  0x75   : > { %337 = dma.hbm_to_vmem [thread:$0]  %s333_s21, 16, %s335_s2, [#allocation3 + $0x4] }
  0x76   : > { %s1456_s10 = smov (!%p670_p9, %s348_s10), 63  ;;  %s403_s19 = sadd.s32 7, %s1237_s16 }
  0x77   : > { %s351_s12 = scalar_lea.hbm %s1417_s1, %s1456_s10  ;;  %p376_p1 = scmp.gt.s32.totalorder %s1331_s27, 0 }
  0x78   : > { %s361_s29 = sshll.u32 %s351_s12, 4  ;;  %s362_s29 = int_to_ptr.hbm [resolvable:$true] %s361_s29 }
  0x79   : > { %s959_s28 = sshra.s32 %s362_s29, 4  ;;  %s960_s28 = int_to_ptr.hbm [resolvable:$true] %s959_s28 }
  0x7a   : > { %s961_s20 = scalar_lea.hbm %s960_s28, 1  ;;  %p964_p3 = scmp.lt.s32.totalorder %s960_s28, %s1417_s1 }
  0x7b   : > { %p962_p2 = scmp.ne.s32.totalorder %s960_s28, %s961_s20  ;;  %p965_p5 = scmp.lt.s32.totalorder %s1267_s7, %s961_s20 }
  0x7d   : > { %p966_p7 = por %p965_p5, %p964_p3 }
  0x7f   : > { %p967_p6 = pnand %p966_p7, %p962_p2 }
  0x81   : > { %970 = shalt.err (!%p967_p6)  }
  0x82   : > { %366 = dma.hbm_to_vmem [thread:$0]  %s362_s29, 16, %s364_s13, [#allocation3 + $0x5] }
  0x83   : > { %s377_s2 = scalar_select %p376_p1, %s1331_s27, 0 }
  0x84   : > { %p676_p9 = scmp.lt.s32.totalorder %s1331_s27, 63  ;;  %s404_s16 = sld [smem:[#allocation5 + %s403_s19]] }
  0x85   : > { %s1141_s26 = smov [#allocation2 + $0x6]  }
  0x86   : > { %s392_s10 = sshll.u32 %s1141_s26, 4  ;;  %s1458_s2 = smov (!%p676_p9, %s377_s2), 63  ;;  %s393_s10 = int_to_ptr.vmem [resolvable:$true] %s392_s10 }
  0x87   : > { %s380_s14 = scalar_lea.hbm %s1417_s1, %s1458_s2 }
  0x88   : > { %s390_s18 = sshll.u32 %s380_s14, 4  ;;  %s391_s18 = int_to_ptr.hbm [resolvable:$true] %s390_s18 }
  0x89   : > { %s983_s12 = sshra.s32 %s391_s18, 4  ;;  %s984_s12 = int_to_ptr.hbm [resolvable:$true] %s983_s12 }
  0x8a   : > { %p405_p10 = scmp.gt.s32.totalorder %s404_s16, 0  ;;  %s985_s13 = scalar_lea.hbm %s984_s12, 1 }
  0x8b   : > { %p986_p11 = scmp.ne.s32.totalorder %s984_s12, %s985_s13  ;;  %p988_p12 = scmp.lt.s32.totalorder %s984_s12, %s1417_s1 }
  0x8c   : > { %p989_p13 = scmp.lt.s32.totalorder %s1267_s7, %s985_s13 }
  0x8e   : > { %p990_p0 = por %p989_p13, %p988_p12 }
  0x90   : > { %p991_p1 = pnand %p990_p0, %p986_p11 }
  0x92   : > { %994 = shalt.err (!%p991_p1)  }
  0x93   : > { %395 = dma.hbm_to_vmem [thread:$0]  %s391_s18, 16, %s393_s10, [#allocation3 + $0x6] }
  0x94   : > { %s406_s27 = scalar_select %p405_p10, %s404_s16, 0 }
  0x95   : > { %p682_p2 = scmp.lt.s32.totalorder %s404_s16, 63  ;;  %s1142_s19 = smov [#allocation2 + $0x7]  }
  0x96   : > { %s421_s20 = sshll.u32 %s1142_s19, 4  ;;  %s422_s20 = int_to_ptr.vmem [resolvable:$true] %s421_s20 }
  0x97   : > { %s1460_s27 = smov (!%p682_p2, %s406_s27), 63 }
  0x98   : > { %s409_s2 = scalar_lea.hbm %s1417_s1, %s1460_s27 }
  0x99   : > { %s419_s26 = sshll.u32 %s409_s2, 4  ;;  %s420_s26 = int_to_ptr.hbm [resolvable:$true] %s419_s26 }
  0x9a   : > { %s1007_s21 = sshra.s32 %s420_s26, 4  ;;  %s1008_s21 = int_to_ptr.hbm [resolvable:$true] %s1007_s21 }
  0x9b   : > { %s1009_s11 = scalar_lea.hbm %s1008_s21, 1  ;;  %p1012_p5 = scmp.lt.s32.totalorder %s1008_s21, %s1417_s1 }
  0x9c   : > { %p1010_p3 = scmp.ne.s32.totalorder %s1008_s21, %s1009_s11  ;;  %p1013_p7 = scmp.lt.s32.totalorder %s1267_s7, %s1009_s11 }
  0x9e   : > { %p1014_p6 = por %p1013_p7, %p1012_p5 }
  0xa0   : > { %p1015_p9 = pnand %p1014_p6, %p1010_p3 }
  0xa2   : > { %1018 = shalt.err (!%p1015_p9)  }
  0xa3   : > { %424 = dma.hbm_to_vmem [thread:$0]  %s420_s26, 16, %s422_s20, [#allocation3 + $0x7] }
  0xa4   : > { %s194_s16 = scalar_lea.vmem [#allocation9], %s1241_s17 }
  0xa5   : > { %1089 = dma.done.wait [#allocation3], 16 }
  0xa6   : > { %1090 = vsyncadd [#allocation3], 4294967280 }
  0xa7   : > { %1091 = dma.done.wait [#allocation3 + $0x1], 16 }
  0xa8   : > { %1092 = vsyncadd [#allocation3 + $0x1], 4294967280 }
  0xa9   : > { %1093 = dma.done.wait [#allocation3 + $0x2], 16 }
  0xaa   : > { %1094 = vsyncadd [#allocation3 + $0x2], 4294967280 }
  0xab   : > { %1095 = dma.done.wait [#allocation3 + $0x3], 16 }
  0xac   : > { %1096 = vsyncadd [#allocation3 + $0x3], 4294967280 }
  0xad   : > { %1097 = dma.done.wait [#allocation3 + $0x4], 16 }
  0xae   : > { %1098 = vsyncadd [#allocation3 + $0x4], 4294967280 }
  0xaf   : > { %1099 = dma.done.wait [#allocation3 + $0x5], 16 }
  0xb0   : > { %1100 = vsyncadd [#allocation3 + $0x5], 4294967280 }
  0xb1   : > { %1101 = dma.done.wait [#allocation3 + $0x6], 16 }
  0xb2   : > { %1102 = vsyncadd [#allocation3 + $0x6], 4294967280 }
  0xb3   : > { %1103 = dma.done.wait [#allocation3 + $0x7], 16 }
  0xb4   : > { %1104 = vsyncadd [#allocation3 + $0x7], 4294967280  ;;  %v441_v0 = vld [vmem:[#allocation2] sm:$0xff]  ;;  %v442_v1 = vld [vmem:[#allocation6] sm:$0xff]  ;;  %v1143_v3 = vmov 128.0   ;;  %s688_s7 = sshll.u32 %s1123_s25, 3 }
  0xb5   : > { %v443_v2 = vadd.f32 %v442_v1, %v441_v0  ;;  %793 = vrcp.f32 %v1143_v3  ;;  %v791_v23 = vld [vmem:[%s1419_s3] ss:$0 sm:$0xff]  ;;  %s494_s28 = scalar_lea.hbm %s1421_s5, %s688_s7  ;;  %s496_s25 = sshll.u32 %s194_s16, 4  ;;  %s497_s25 = int_to_ptr.vmem [resolvable:$true] %s496_s25 }
  0xb6   : > { %v792_v26 = vld [vmem:[%s1420_s4] ss:$0 sm:$0xff]  ;;  %s498_s20 = sshll.u32 %s494_s28, 4  ;;  %s1435_s15 = sand.u32 1, %s1115_s23   ;;  %s499_s20 = int_to_ptr.hbm [resolvable:$true] %s498_s20 }
  0xb7   : > { %444 = vadd.xlane.f32.xlu0 %v443_v2  ;;  %s483_s30 = scalar_lea.sflag [#allocation8], %s1435_s15  ;;  %s1045_s2 = sshra.s32 %s499_s20, 4  ;;  %s1046_s2 = int_to_ptr.hbm [resolvable:$true] %s1045_s2 }
  0xb8   : > { %s1047_s26 = scalar_lea.hbm %s1046_s2, 8  ;;  %s1051_s14 = scalar_lea.hbm %s1421_s5, 16 }
  0xb9   : > { %p1048_p10 = scmp.ne.s32.totalorder %s1046_s2, %s1047_s26  ;;  %p1052_p13 = scmp.lt.s32.totalorder %s1046_s2, %s1421_s5 }
  0xba   : > { %p1053_p0 = scmp.lt.s32.totalorder %s1051_s14, %s1047_s26 }
  0xbb   : > { %v794_v4 = vpop.eup %793  ;;  %p1049_p11 = pnand %p1048_p10, %p1217_p4 }
  0xbc   : > { %v447_v5 = vmul.f32 128.0, %v794_v4  ;;  %vm451_vm0 = vweird.f32 %v794_v4  ;;  %p1054_p1 = por %p1053_p0, %p1052_p13 }
  0xbd   : > { %p1050_p12 = pneg %p1049_p11 }
  0xbe   : > { %v448_v6 = vsub.f32 1.0, %v447_v5 }
  0xbf   : > { %p1055_p2 = pnand %p1054_p1, %p1050_p12 }
  0xc0   : > { %v449_v7 = vmul.f32 %v794_v4, %v448_v6 }
  0xc2   : > { %v450_v8 = vadd.f32 %v794_v4, %v449_v7 }
  0xc4   : > { %v452_v9 = vsel %vm451_vm0, %v794_v4, %v450_v8 }
 0x12a   : > { %v445_v10 = vpop.xlane.xlu0 %444 }
 0x12b   : > { %v453_v11 = vmul.f32 %v452_v9, %v445_v10 }
 0x12d   : > { %v454_v12 = vsub.f32 %v443_v2, %v453_v11 }
 0x12f   : > { %v455_v13 = vmul.f32 %v454_v12, %v454_v12 }
 0x131   : > { %456 = vadd.xlane.f32.xlu0 %v455_v13 }
 0x1a4   : > { %v457_v14 = vpop.xlane.xlu0 %456 }
 0x1a5   : > { %v458_v15 = vmul.f32 %v457_v14, %v452_v9 }
 0x1a7   : > { %v459_v16 = vadd.f32 1e-06, %v458_v15 }
 0x1a9   : > { %795 = vrsqrt.f32 %v459_v16  ;;  %vm466_vm2 = vweird.f32 %v459_v16 }
 0x1af   : > { %v796_v17 = vpop.eup %795 }
 0x1b0   : > { %v461_v18 = vmul.f32 %v796_v17, %v459_v16  ;;  %vm467_vm1 = vweird.f32 %v796_v17 }
 0x1b1   : > { %vm468_vm3 = vmor %vm466_vm2, %vm467_vm1 }
 0x1b2   : > { %v462_v19 = vmul.f32 %v796_v17, %v461_v18 }
 0x1b4   : > { %v463_v20 = vmul.f32 0.5, %v462_v19 }
 0x1b6   : > { %v464_v21 = vsub.f32 1.5, %v463_v20 }
 0x1b8   : > { %v465_v22 = vmul.f32 %v796_v17, %v464_v21 }
 0x1ba   : > { %v469_v24 = vsel %vm468_vm3, %v796_v17, %v465_v22 }
 0x1bb   : > { %v470_v25 = vmul.f32 %v469_v24, %v454_v12 }
 0x1bd   : > { %v475_v27 = vmul.f32 %v791_v23, %v470_v25 }
 0x1bf   : > { %v480_v28 = vadd.f32 %v792_v26, %v475_v27 }
 0x1c1   : > { %481 = vst [vmem:[%s194_s16] sm:$0xff] %v480_v28 }
 0x1c2   : > { %1058 = shalt.err (!%p1055_p2)
}
 0x1c3   : > { %719 = dma.vmem_to_hbm [thread:$0]  (%p1217_p4), %s497_s25, 128, %s499_s20, %s483_s30  }
 0x1c4 PF: > { %p731_p3 = scmp.ge.s32.totalorder %s1131_s0, 2  ;;  %s510_s17 = sand.u32 1, %s1111_s22  }
 0x1c5   : > { %s511_s16 = scalar_lea.sflag [#allocation8], %s510_s17 }
 0x1c6   : > { %p726_p5 = pnand %p731_p3, %p1224_p8 }
 0x1c8   : > { %p727_p7 = pneg %p726_p5 }
 0x1ca   : > { %1106 = dma.done.wait (%p727_p7), %s511_s16, 128  }
 0x1cb   : > { %1108 = vsyncadd (%p727_p7), %s511_s16, 4294967168  ;;  %s27_s0 = sadd.s32 1, %s1131_s0   ;;  %s1436_s25 = sld [smem:[#allocation39_spill]] }
 0x1cc   : > { %p24_p6 = scmp.ge.s32.totalorder %s27_s0, 4   ;;  %s1437_s26 = sld [smem:[#allocation40_spill]] }
 0x1cd   : > { %s1438_s22 = smov %s1115_s23  ;;  %s1439_s23 = smov %s1119_s24 }
 0x1ce   : > { %s1440_s24 = smov %s1230_s9  ;;  %26 = sbr.rel (!%p24_p6) target bundleno = 11 (0xb), region = 131 }
 0x1d3   :  { %517 = vsyncpa [#allocation7], 1 }
 0x1d4   :  { %519 = vsyncpa [#allocation7 + $0x1], 1 }
 0x1d5   :  { %520 = vsyncpa [#allocation8], 1 }
 0x1d6   :  { %522 = vsyncpa [#allocation8 + $0x1], 1 }
 0x1d7   :  { %523 = vsyncmov [#allocation3] }
 0x1da   :  { %s524_s6 = vpop.sfrf %523 }
 0x1db   :  { %p691_p4 = scmp.ne.s32.totalorder %s524_s6, 0 }
 0x1dd   :  { %528 = shalt.err (%p691_p4)  }
 0x1de   :  { %530 = vsyncmov [#allocation3 + $0x1] }
 0x1e1   :  { %s531_s8 = vpop.sfrf %530 }
 0x1e2   :  { %p692_p8 = scmp.ne.s32.totalorder %s531_s8, 0 }
 0x1e4   :  { %535 = shalt.err (%p692_p8)  }
 0x1e5   :  { %537 = vsyncmov [#allocation3 + $0x2] }
 0x1e8   :  { %s538_s9 = vpop.sfrf %537 }
 0x1e9   :  { %p693_p9 = scmp.ne.s32.totalorder %s538_s9, 0 }
 0x1eb   :  { %542 = shalt.err (%p693_p9)  }
 0x1ec   :  { %544 = vsyncmov [#allocation3 + $0x3] }
 0x1ef   :  { %s545_s10 = vpop.sfrf %544 }
 0x1f0   :  { %p694_p10 = scmp.ne.s32.totalorder %s545_s10, 0 }
 0x1f2   :  { %549 = shalt.err (%p694_p10)  }
 0x1f3   :  { %551 = vsyncmov [#allocation3 + $0x4] }
 0x1f6   :  { %s552_s1 = vpop.sfrf %551 }
 0x1f7   :  { %p695_p11 = scmp.ne.s32.totalorder %s552_s1, 0 }
 0x1f9   :  { %556 = shalt.err (%p695_p11)  }
 0x1fa   :  { %558 = vsyncmov [#allocation3 + $0x5] }
 0x1fd   :  { %s559_s3 = vpop.sfrf %558 }
 0x1fe   :  { %p696_p12 = scmp.ne.s32.totalorder %s559_s3, 0 }
 0x200   :  { %563 = shalt.err (%p696_p12)  }
 0x201   :  { %565 = vsyncmov [#allocation3 + $0x6] }
 0x204   :  { %s566_s4 = vpop.sfrf %565 }
 0x205   :  { %p697_p13 = scmp.ne.s32.totalorder %s566_s4, 0 }
 0x207   :  { %570 = shalt.err (%p697_p13)  }
 0x208   :  { %572 = vsyncmov [#allocation3 + $0x7] }
 0x20b   :  { %s573_s5 = vpop.sfrf %572 }
 0x20c   :  { %p698_p0 = scmp.ne.s32.totalorder %s573_s5, 0 }
 0x20e   :  { %577 = shalt.err (%p698_p0)  }

</bundles_post_ra>
